<compile_context>
chip_gen: v7x
topology: tpu7x:2x2x1
jax: 0.10.0
libtpu: 0.0.40
codegen_flags: <defaults>
</compile_context>

<pallas_src>
import functools
import math

import jax
import jax.numpy as jnp
from jax.experimental import pallas as pl
from jax.experimental.pallas import tpu as pltpu


_LANES = 128
_SUBLANES = 8
_NUM_CORES = 2           # megacore split (v7x); plain serial loop on v5e/v6e
_MAX_BLOCK_ROWS = 4096   # 4096 * 128 * 4B = 2 MiB per f32 input buffer


def _margin_ranking_kernel(x1_ref, x2_ref, t_ref, out_ref, acc_ref, *, flip):
    """One (block_rows, 128) tile: elementwise hinge, accumulate into scratch.

    x1_ref, x2_ref, t_ref : (block_rows, 128) input tiles
    out_ref               : (8, 128) per-core output block (written once)
    acc_ref               : (block_rows, 128) f32 VMEM accumulator
    flip                  : static; True when p < 0 (sign folded into diff)
    """
    i = pl.program_id(1)

    @pl.when(i == 0)
    def _():
        acc_ref[...] = jnp.zeros_like(acc_ref)

    x1 = x1_ref[...].astype(jnp.float32)
    x2 = x2_ref[...].astype(jnp.float32)
    t = t_ref[...].astype(jnp.float32)

    # max(-t * (x1 - x2) * p, 0) == |p| * max(sign(p) * (x2 - x1) * t, 0)
    diff = (x1 - x2) if flip else (x2 - x1)
    acc_ref[...] += jnp.maximum(diff * t, 0.0)

    @pl.when(i == pl.num_programs(1) - 1)
    def _():
        total = jnp.sum(acc_ref[...])                      # one reduce per core
        out_ref[...] = jnp.full(out_ref.shape, total, jnp.float32)


def _round_up(x, m):
    return -(-x // m) * m


def margin_ranking_loss_scale(input1, input2, target, *, p=1.25,
                              max_block_rows=_MAX_BLOCK_ROWS):
    """loss = mean(max(-target * (input1 - input2) * p, 0)). Returns a scalar."""
    assert input1.shape == input2.shape == target.shape
    n = math.prod(input1.shape)
    assert n > 0
    p = float(p)

    rows = -(-n // _LANES)                                   # cdiv(n, 128)
    rows_per_core = -(-rows // _NUM_CORES)
    block_rows = min(max_block_rows, _round_up(max(rows_per_core, 1), _SUBLANES))
    blocks_per_core = -(-rows_per_core // block_rows)
    rows_padded = blocks_per_core * block_rows * _NUM_CORES
    n_padded = rows_padded * _LANES

    def prep(x):
        x = x.reshape(-1)
        if n_padded != n:
            # zero pad: padded target==0 -> contributes 0 to the hinge sum
            x = jnp.pad(x, (0, n_padded - n))
        return x.reshape(rows_padded, _LANES)

    x1 = prep(input1)
    x2 = prep(input2)
    t = prep(target.astype(input1.dtype))

    in_map = lambda c, i: (c * blocks_per_core + i, 0)
    in_spec = pl.BlockSpec((block_rows, _LANES), in_map)

    partials = pl.pallas_call(
        functools.partial(_margin_ranking_kernel, flip=(p < 0.0)),
        out_shape=jax.ShapeDtypeStruct((_NUM_CORES * _SUBLANES, _LANES),
                                       jnp.float32),
        grid_spec=pltpu.PrefetchScalarGridSpec(
            num_scalar_prefetch=0,
            grid=(_NUM_CORES, blocks_per_core),
            in_specs=[in_spec, in_spec, in_spec],
            out_specs=pl.BlockSpec((_SUBLANES, _LANES), lambda c, i: (c, 0)),
            scratch_shapes=[pltpu.VMEM((block_rows, _LANES), jnp.float32)],
        ),
        compiler_params=pltpu.CompilerParams(
            dimension_semantics=("parallel", "arbitrary"),
            vmem_limit_bytes=48 * 1024 * 1024,
        ),
    )(x1, x2, t)

    # Each core's (8,128) output block is filled with its partial sum.
    per_core = partials.reshape(_NUM_CORES, _SUBLANES, _LANES)[:, 0, 0]
    total = jnp.sum(per_core)
    return (total * (abs(p) / n)).astype(input1.dtype)


def _reference(x1, x2, t, p=1.25):
    return jnp.mean(jnp.maximum(-t * (x1 - x2) * p, 0.0))


if __name__ == "__main__":
    key = jax.random.PRNGKey(0)
    k1, k2, k3 = jax.random.split(key, 3)

    # Test 1: small ragged size (not a multiple of 128) -> exercises padding.
    N = 300
    input1 = jax.random.normal(k1, (N,), dtype=jnp.float32)
    input2 = jax.random.normal(k2, (N,), dtype=jnp.float32)
    target = jnp.where(jax.random.bernoulli(k3, 0.5, (N,)),
                       1.0, -1.0).astype(jnp.float32)

    loss = margin_ranking_loss_scale(input1, input2, target, p=1.25)
    jax.block_until_ready(loss)
    ref = _reference(input1, input2, target, p=1.25)
    assert jnp.allclose(loss, ref, atol=1e-5, rtol=1e-5), (loss, ref)

    # Test 2: aligned size with a tiny block override -> exercises multi-block
    # accumulation (init / accumulate / finalize path across grid steps).
    N2 = 4096
    a = jax.random.normal(k1, (N2,), dtype=jnp.float32)
    b = jax.random.normal(k2, (N2,), dtype=jnp.float32)
    y = jnp.where(jax.random.bernoulli(k3, 0.5, (N2,)),
                  1.0, -1.0).astype(jnp.float32)
    loss2 = margin_ranking_loss_scale(a, b, y, p=1.25, max_block_rows=8)
    jax.block_until_ready(loss2)
    ref2 = _reference(a, b, y, p=1.25)
    assert jnp.allclose(loss2, ref2, atol=1e-5, rtol=1e-5), (loss2, ref2)

    print("KERNEL_OK")
</pallas_src>

<mosaic_0001>
module attributes {stable_mosaic.version = 11 : i64} {
  func.func @_margin_ranking_kernel(%arg0: i32, %arg1: i32, %arg2: memref<8x128xf32, #tpu.memory_space<vmem>>, %arg3: memref<8x128xf32, #tpu.memory_space<vmem>>, %arg4: memref<8x128xf32, #tpu.memory_space<vmem>>, %arg5: memref<8x128xf32, #tpu.memory_space<vmem>>, %arg6: memref<8x128xf32, #tpu.memory_space<vmem>>) attributes {dimension_semantics = [#tpu.dimension_semantics<parallel>, #tpu.dimension_semantics<arbitrary>], iteration_bounds = array<i64: 2, 1>, scalar_prefetch = 0 : i64, scratch_operands = 1 : i64, tpu.core_type = #tpu.core_type<tc>, window_params = [{transform_indices = @transform_0, window_bounds = array<i64: 8, 128>}, {transform_indices = @transform_1, window_bounds = array<i64: 8, 128>}, {transform_indices = @transform_2, window_bounds = array<i64: 8, 128>}, {transform_indices = @transform_3, window_bounds = array<i64: 8, 128>}]} {
    %c0_i32 = arith.constant 0 : i32
    %0 = arith.cmpi eq, %arg1, %c0_i32 : i32
    %1 = arith.extui %0 : i1 to i32
    %c0_i32_0 = arith.constant 0 : i32
    %2 = arith.cmpi ne, %1, %c0_i32_0 : i32
    scf.if %2 {
      %cst_12 = arith.constant 0.000000e+00 : f32
      %16 = vector.broadcast %cst_12 : f32 to vector<8x128xf32>
      %c0_13 = arith.constant 0 : index
      %c0_14 = arith.constant 0 : index
      %17 = vector.load %arg6[%c0_13, %c0_14] : memref<8x128xf32, #tpu.memory_space<vmem>>, vector<8x128xf32>
      tpu.vector_store %arg6[%c0_13, %c0_14], %16 {strides = array<i32>} : memref<8x128xf32, #tpu.memory_space<vmem>>, vector<8x128xf32>,
    } else {
    }
    %c0 = arith.constant 0 : index
    %c0_1 = arith.constant 0 : index
    %3 = vector.load %arg2[%c0, %c0_1] : memref<8x128xf32, #tpu.memory_space<vmem>>, vector<8x128xf32>
    %c0_2 = arith.constant 0 : index
    %c0_3 = arith.constant 0 : index
    %4 = vector.load %arg3[%c0_2, %c0_3] : memref<8x128xf32, #tpu.memory_space<vmem>>, vector<8x128xf32>
    %c0_4 = arith.constant 0 : index
    %c0_5 = arith.constant 0 : index
    %5 = vector.load %arg4[%c0_4, %c0_5] : memref<8x128xf32, #tpu.memory_space<vmem>>, vector<8x128xf32>
    %6 = arith.subf %4, %3 : vector<8x128xf32>
    %c0_6 = arith.constant 0 : index
    %c0_7 = arith.constant 0 : index
    %7 = vector.load %arg6[%c0_6, %c0_7] : memref<8x128xf32, #tpu.memory_space<vmem>>, vector<8x128xf32>
    %8 = arith.mulf %6, %5 : vector<8x128xf32>
    %cst = arith.constant 0.000000e+00 : f32
    %9 = vector.broadcast %cst : f32 to vector<8x128xf32>
    %10 = arith.maximumf %8, %9 : vector<8x128xf32>
    %11 = arith.addf %7, %10 : vector<8x128xf32>
    %c0_8 = arith.constant 0 : index
    %c0_9 = arith.constant 0 : index
    %12 = vector.load %arg6[%c0_8, %c0_9] : memref<8x128xf32, #tpu.memory_space<vmem>>, vector<8x128xf32>
    tpu.vector_store %arg6[%c0_8, %c0_9], %11 {strides = array<i32>} : memref<8x128xf32, #tpu.memory_space<vmem>>, vector<8x128xf32>,
    %c0_i32_10 = arith.constant 0 : i32
    %13 = arith.cmpi eq, %arg1, %c0_i32_10 : i32
    %14 = arith.extui %13 : i1 to i32
    %c0_i32_11 = arith.constant 0 : i32
    %15 = arith.cmpi ne, %14, %c0_i32_11 : i32
    scf.if %15 {
      %c0_12 = arith.constant 0 : index
      %c0_13 = arith.constant 0 : index
      %16 = vector.load %arg6[%c0_12, %c0_13] : memref<8x128xf32, #tpu.memory_space<vmem>>, vector<8x128xf32>
      %17 = vector.shape_cast %16 : vector<8x128xf32> to vector<1x8x128xf32>
      %cst_14 = arith.constant dense<0.000000e+00> : vector<1xf32>
      %18 = vector.multi_reduction <add>, %17, %cst_14 [1, 2] : vector<1x8x128xf32> to vector<1xf32>
      %19 = vector.shape_cast %18 : vector<1xf32> to vector<1x1x1xf32>
      %20 = vector.extract %19[0, 0, 0] : f32 from vector<1x1x1xf32>
      %21 = vector.broadcast %20 : f32 to vector<8x128xf32>
      %c0_15 = arith.constant 0 : index
      %c0_16 = arith.constant 0 : index
      %22 = vector.load %arg5[%c0_15, %c0_16] : memref<8x128xf32, #tpu.memory_space<vmem>>, vector<8x128xf32>
      tpu.vector_store %arg5[%c0_15, %c0_16], %21 {strides = array<i32>} : memref<8x128xf32, #tpu.memory_space<vmem>>, vector<8x128xf32>,
    } else {
    }
    return
  }
  func.func @transform_0(%arg0: i32, %arg1: i32) -> (i32, i32) {
    %c1_i32 = arith.constant 1 : i32
    %0 = arith.muli %arg0, %c1_i32 : i32
    %1 = arith.addi %0, %arg1 : i32
    %c0_i32 = arith.constant 0 : i32
    %c0_i32_0 = arith.constant 0 : i32
    return %1, %c0_i32 : i32, i32
  }
  func.func @transform_1(%arg0: i32, %arg1: i32) -> (i32, i32) {
    %c1_i32 = arith.constant 1 : i32
    %0 = arith.muli %arg0, %c1_i32 : i32
    %1 = arith.addi %0, %arg1 : i32
    %c0_i32 = arith.constant 0 : i32
    %c0_i32_0 = arith.constant 0 : i32
    return %1, %c0_i32 : i32, i32
  }
  func.func @transform_2(%arg0: i32, %arg1: i32) -> (i32, i32) {
    %c1_i32 = arith.constant 1 : i32
    %0 = arith.muli %arg0, %c1_i32 : i32
    %1 = arith.addi %0, %arg1 : i32
    %c0_i32 = arith.constant 0 : i32
    %c0_i32_0 = arith.constant 0 : i32
    return %1, %c0_i32 : i32, i32
  }
  func.func @transform_3(%arg0: i32, %arg1: i32) -> (i32, i32) {
    %c0_i32 = arith.constant 0 : i32
    %c0_i32_0 = arith.constant 0 : i32
    return %arg0, %c0_i32 : i32, i32
  }
}

</mosaic_0001>

<bundles_post_ra>
// kernel: tpu_custom_call.1
= control target key start
LH: loop header
LB: loop body
LE: loop exit
PB: predicated region body
PF: predicated region fallthrough
CT: control target
= control target key end

     0   :  { %s1007_s0 = inlined_call_operand.hbm [shape: f32[16,128], index: 0, kind: input, shape index: {}]   ;;  %s1008_s1 = inlined_call_operand.hbm [shape: f32[16,128], index: 1, kind: input, shape index: {}]   ;;  %s1009_s2 = inlined_call_operand.hbm [shape: f32[16,128], index: 2, kind: input, shape index: {}]   ;;  %s1010_s3 = inlined_call_operand.hbm [shape: f32[16,128], index: 3, kind: output, shape index: {}]  }
   0x1   :  { %1016 = sst [smem:[#allocation16_spill]] %s1008_s1 }
   0x2   :  { %8 = vsyncpa [#allocation4], 0 }
   0x3   :  { %10 = vsyncpa [#allocation4 + $0x1], 0 }
   0x4   :  { %11 = vsyncpa [#allocation7], 0 }
   0x5   :  { %13 = vsyncpa [#allocation7 + $0x1], 0 }
   0x6   :  { %14 = vsyncpa [#allocation5], 0 }
   0x7   :  { %16 = vsyncpa [#allocation5 + $0x1], 0  ;;  %s743_s12 = smov 0   ;;  %s745_s13 = smov 0  }
   0x8   :  { %s747_s14 = smov 0   ;;  %s749_s15 = smov 0  }
   0x9   :  { %s751_s16 = smov 0   ;;  %s753_s17 = smov 0  }
   0xa LB: > { %1017 = sst [smem:[#allocation13_spill]] %s713_s16  ;;  %s774_s18 = sadd.s32 4294967295, %s717_s17   ;;  %s717_s17 = sphi %s753_s17, %s22_s17   ;;  %s713_s16 = sphi %s751_s16, %s1038_s16   ;;  %s709_s15 = sphi %s749_s15, %s1037_s15   ;;  %s705_s14 = sphi %s747_s14, %s1041_s14   ;;  %s701_s13 = sphi %s745_s13, %s1040_s13   ;;  %s697_s12 = sphi %s743_s12, %s1039_s12  }
   0xb   : > { %s449_s19 = sadd.s32 4294967294, %s717_s17   ;;  %s34_s20 = sadd.s32 1, %s713_s16 }
   0xc   : > { %s43_s21 = sadd.s32 1, %s705_s14  ;;  %p36_p0 = scmp.ge.s32.totalorder %s34_s20, 2 }
   0xd   : > { %p50_p1 = scmp.ne.s32.totalorder %s705_s14, %s701_s13  ;;  %p51_p2 = scmp.eq.s32.totalorder %s717_s17, 0 }
   0xe   : > { %p56_p3 = scmp.ne.s32.totalorder %s701_s13, %s697_s12  ;;  %s1043_s20 = smov (%p36_p0, %s34_s20), 0 }
   0xf   : > { %1018 = sst [smem:[#allocation14_spill]] %s1043_s20  ;;  %p786_p4 = por %p51_p2, %p50_p1 }
  0x10   : > { %p57_p5 = scmp.eq.s32.totalorder %s774_s18, 0  ;;  %s40_s23 = ssub.s32 %s713_s16, %s1043_s20 }
  0x11   : > { %p136_p6 = scmp.eq.s32.totalorder %s774_s18, 1  ;;  %p41_p7 = scmp.eq.s32.totalorder %s40_s23, 0 }
  0x12   : > { %p794_p8 = por %p57_p5, %p56_p3  ;;  %p142_p10 = scmp.eq.s32.totalorder %s449_s19, 1 }
  0x13   : > { %p798_p9 = por %p136_p6, %p50_p1  ;;  %p491_p13 = scmp.lt.s32.totalorder %s717_s17, 2 }
  0x14   : > { %s1020_s24 = scalar_select %p794_p8, 1, 0 }
  0x15   : > { %s1021_s25 = scalar_select %p798_p9, 1, 0 }
  0x16   : > { %s803_s26 = scalar_select %p41_p7, %s705_s14, %s43_s21  }
  0x17   : > { %p805_p11 = por %p142_p10, %p56_p3  ;;  %s162_s28 = sand.u32 1, %s705_s14  }
  0x18   : > { %1022 = sst [smem:[#allocation15_spill]] %s803_s26  ;;  %s814_s29 = sshll.u32 %s162_s28, 3 }
  0x19   : > { %s1023_s27 = scalar_select %p805_p11, 1, 0 }
  0x1a   : > { %s817_s30 = sshll.u32 %s713_s16, 7  ;;  %p821_p0 = pnand %p491_p13, %p786_p4 }
  0x1b   : > { %s181_s5 = sand.u32 1, %s717_s17   ;;  %s1025_s1 = sld [smem:[#allocation16_spill]] }
  0x1c   : > { %s1024_s4 = scalar_select %p821_p0, 1, 0 }
  0x1d   : > { %s185_s9 = scalar_lea.vmem [#allocation6], %s814_s29  ;;  %s837_s11 = scalar_lea.sflag [#allocation7], %s181_s5 }
  0x1e   : > { %s193_s10 = sshll.u32 %s185_s9, 4  ;;  %p843_p4 = pneg %p821_p0  ;;  %s834_s10 = int_to_ptr.vmem [resolvable:$true] %s193_s10 }
  0x21   : > { %s830_s8 = scalar_lea.hbm %s1025_s1, %s817_s30  ;;  %s546_s6 = scalar_lea.hbm %s1025_s1, 256 }
  0x22   : > { %s541_s19 = scalar_lea.hbm %s830_s8, 128  ;;  %p547_p7 = scmp.lt.u32.totalorder %s830_s8, %s1025_s1 }
  0x23   : > { %p542_p3 = scmp.ne.s32.totalorder %s830_s8, %s541_s19  ;;  %p548_p10 = scmp.lt.u32.totalorder %s546_s6, %s541_s19 }
  0x24   : > { %p550_p12 = scmp.lt.u32.totalorder %s541_s19, %s830_s8 }
  0x25   : > { %p544_p5 = pnand %p843_p4, %p542_p3  ;;  %p549_p13 = por %p548_p10, %p547_p7 }
  0x27   : > { %p545_p6 = pneg %p544_p5  ;;  %p551_p1 = por %p550_p12, %p549_p13 }
  0x29   : > { %p552_p2 = pnand %p551_p1, %p545_p6 }
  0x2b   : > { %555 = shalt.err (!%p552_p2)
}
  0x2c   : > { %s556_s5 = scalar_lea.vmem %s834_s10, 128  ;;  %s719_s22 = smov [#allocation6]  }
  0x2d   : > { %p557_p3 = scmp.ne.s32.totalorder %s834_s10, %s556_s5  ;;  %s561_s23 = sshll.u32 %s719_s22, 4  ;;  %s562_s23 = int_to_ptr.vmem [resolvable:$false] %s561_s23 }
  0x2e   : > { %s563_s7 = scalar_lea.vmem %s562_s23, 256  ;;  %p564_p9 = scmp.lt.s32.totalorder %s834_s10, %s562_s23 }
  0x2f   : > { %p559_p5 = pnand %p557_p3, %p843_p4  ;;  %p565_p8 = scmp.lt.s32.totalorder %s563_s7, %s556_s5 }
  0x31   : > { %p560_p11 = pneg %p559_p5  ;;  %p566_p7 = por %p565_p8, %p564_p9 }
  0x33   : > { %p567_p10 = pnand %p566_p7, %p560_p11 }
  0x35   : > { %570 = shalt.err (!%p567_p10)
}
  0x36   : > { %483 = dma.hbm_to_vmem [thread:$0]  (!%p821_p0), %s830_s8, 128, %s834_s10, %s837_s11  }
  0x37   : > { %p1027_p12 = scmp.lt.s32.totalorder %s717_s17, 3  ;;  %p1028_p1 = scmp.ge.s32.totalorder %s717_s17, 1 }
  0x38   : > { %s879_s5 = scalar_lea.hbm %s1007_s0, %s817_s30  ;;  %s166_s22 = scalar_lea.vmem [#allocation3], %s814_s29 }
  0x39   : > { %p871_p2 = pnand %p1028_p1, %p1027_p12  ;;  %s174_s23 = sshll.u32 %s166_s22, 4  ;;  %s882_s23 = int_to_ptr.vmem [resolvable:$true] %s174_s23 }
  0x3a   : > { %s888_s7 = scalar_lea.hbm %s1009_s2, %s817_s30  ;;  %s163_s1 = scalar_lea.sflag [#allocation4], %s162_s28 }
  0x3b   : > { %s1029_s19 = scalar_select %p871_p2, 1, 0 }
  0x3c   : > { %s571_s20 = scalar_lea.hbm %s879_s5, 128  ;;  %s576_s16 = scalar_lea.hbm %s1007_s0, 256 }
  0x3d   : > { %p572_p8 = scmp.ne.s32.totalorder %s879_s5, %s571_s20  ;;  %p577_p6 = scmp.lt.u32.totalorder %s879_s5, %s1007_s0 }
  0x3e   : > { %p578_p13 = scmp.lt.u32.totalorder %s576_s16, %s571_s20  ;;  %p580_p5 = scmp.lt.u32.totalorder %s571_s20, %s879_s5 }
  0x3f   : > { %p574_p9 = pnand %p572_p8, %p843_p4 }
  0x40   : > { %p579_p3 = por %p578_p13, %p577_p6 }
  0x41   : > { %p575_p11 = pneg %p574_p9 }
  0x42   : > { %p581_p7 = por %p580_p5, %p579_p3 }
  0x44   : > { %p582_p10 = pnand %p581_p7, %p575_p11 }
  0x46   : > { %585 = shalt.err (!%p582_p10)
}
  0x47   : > { %s586_s28 = scalar_lea.vmem %s882_s23, 128  ;;  %s720_s30 = smov [#allocation3]  }
  0x48   : > { %p587_p12 = scmp.ne.s32.totalorder %s882_s23, %s586_s28  ;;  %s591_s8 = sshll.u32 %s720_s30, 4  ;;  %s592_s8 = int_to_ptr.vmem [resolvable:$false] %s591_s8 }
  0x49   : > { %s593_s26 = scalar_lea.vmem %s592_s8, 256  ;;  %p594_p9 = scmp.lt.s32.totalorder %s882_s23, %s592_s8 }
  0x4a   : > { %p589_p1 = pnand %p587_p12, %p843_p4  ;;  %p595_p2 = scmp.lt.s32.totalorder %s593_s26, %s586_s28 }
  0x4c   : > { %p590_p8 = pneg %p589_p1  ;;  %p596_p6 = por %p595_p2, %p594_p9 }
  0x4e   : > { %p597_p13 = pnand %p596_p6, %p590_p8 }
  0x50   : > { %600 = shalt.err (!%p597_p13)
}
  0x51   : > { %480 = dma.hbm_to_vmem [thread:$0]  (!%p821_p0), %s879_s5, 128, %s882_s23, %s163_s1  }
  0x52   : > { %s204_s16 = scalar_lea.vmem [#allocation8], %s814_s29  ;;  %s601_s10 = scalar_lea.hbm %s888_s7, 128 }
  0x53   : > { %s212_s20 = sshll.u32 %s204_s16, 4  ;;  %p602_p11 = scmp.ne.s32.totalorder %s888_s7, %s601_s10  ;;  %s213_s20 = int_to_ptr.vmem [resolvable:$true] %s212_s20 }
  0x54   : > { %s606_s22 = scalar_lea.hbm %s1009_s2, 256  ;;  %p607_p5 = scmp.lt.u32.totalorder %s888_s7, %s1009_s2 }
  0x55   : > { %p604_p2 = pnand %p602_p11, %p843_p4  ;;  %p608_p7 = scmp.lt.u32.totalorder %s606_s22, %s601_s10 }
  0x56   : > { %p610_p12 = scmp.lt.u32.totalorder %s601_s10, %s888_s7 }
  0x57   : > { %p605_p3 = pneg %p604_p2  ;;  %p609_p10 = por %p608_p7, %p607_p5 }
  0x59   : > { %p611_p1 = por %p610_p12, %p609_p10 }
  0x5b   : > { %p612_p8 = pnand %p611_p1, %p605_p3 }
  0x5d   : > { %615 = shalt.err (!%p612_p8)
}
  0x5e   : > { %s616_s1 = scalar_lea.vmem %s213_s20, 128  ;;  %s721_s29 = smov [#allocation8]  }
  0x5f   : > { %p617_p9 = scmp.ne.s32.totalorder %s213_s20, %s616_s1  ;;  %s621_s5 = sshll.u32 %s721_s29, 4  ;;  %s622_s5 = int_to_ptr.vmem [resolvable:$false] %s621_s5 }
  0x60   : > { %s623_s23 = scalar_lea.vmem %s622_s5, 256  ;;  %p624_p11 = scmp.lt.s32.totalorder %s213_s20, %s622_s5 }
  0x61   : > { %p619_p6 = pnand %p617_p9, %p843_p4  ;;  %p625_p2 = scmp.lt.s32.totalorder %s623_s23, %s616_s1 }
  0x63   : > { %p620_p13 = pneg %p619_p6  ;;  %p626_p0 = por %p625_p2, %p624_p11 }
  0x65   : > { %p627_p5 = pnand %p626_p0, %p620_p13 }
  0x67   : > { %630 = shalt.err (!%p627_p5)
}
  0x68   : > { %p1030_p7 = scmp.ne.s32.totalorder %s1024_s4, 0  ;;  %p1031_p3 = scmp.ne.s32.totalorder %s1029_s19, 0 }
  0x69   : > { %s935_s21 = sand.u32 (!%p1031_p3), 1, %s701_s13   ;;  %p1032_p0 = scmp.ne.s32.totalorder (!%p1031_p3), %s1020_s24, 0 }
  0x6a   : > { %486 = dma.hbm_to_vmem [thread:$0]  (!%p1030_p7), %s888_s7, 128, %s213_s20, %s837_s11  }
  0x6b   : > { %221 = sbr.rel (%p1031_p3) target bundleno = 344 (0x158), region = 32  ;;  %s938_s8 = sshll.u32 (!%p1031_p3), %s935_s21, 3 }
  0x6c   : > { %s224_s26 = scalar_lea.sflag (!%p1031_p3), [#allocation4], %s935_s21  ;;  %s227_s16 = scalar_lea.vmem (!%p1031_p3), [#allocation3], %s938_s8 }
  0x72   : > { %684 = dma.done.wait (%p1032_p0), %s224_s26, 128  }
  0x73   : > { %686 = vsyncadd (%p1032_p0), %s224_s26, 4294967168  ;;  %s232_s4 = sand.u32 1, %s774_s18   ;;  %s236_s19 = scalar_lea.vmem [#allocation6], %s938_s8 }
  0x74   : > { %s233_s11 = scalar_lea.sflag [#allocation7], %s232_s4 }
  0x75   : > { %688 = dma.done.wait (%p1032_p0), %s233_s11, 256  }
  0x76   : > { %690 = vsyncadd (%p1032_p0), %s233_s11, 4294967040  ;;  %v286_v0 = vld [vmem:[%s227_s16] sm:$0xff]  ;;  %v287_v1 = vld [vmem:[%s236_s19] sm:$0xff]  ;;  %s245_s7 = scalar_lea.vmem [#allocation8], %s938_s8  ;;  %s277_s18 = scalar_lea.vmem [#allocation9], %s938_s8 }
  0x77   : > { %v288_v2 = vld [vmem:[%s245_s7] sm:$0xff]  ;;  %v289_v3 = vsub.f32 %v287_v1, %v286_v0  ;;  %s324_s24 = sshll.u32 %s277_s18, 4  ;;  %s464_s20 = sshll.u32 %s709_s15, 7  ;;  %s955_s24 = int_to_ptr.vmem [resolvable:$true] %s324_s24 }
  0x78   : > { %s960_s22 = scalar_lea.hbm %s1010_s3, %s464_s20  ;;  %s311_s28 = scalar_lea.sflag [#allocation5], %s935_s21 }
  0x79   : > { %v291_v4 = vmul.f32 %v289_v3, %v288_v2  ;;  %s631_s30 = scalar_lea.vmem %s955_s24, 128  ;;  %p1033_p10 = scmp.ne.s32.totalorder %s1021_s25, 0 }
  0x7a   : > { %p632_p4 = scmp.ne.s32.totalorder %s955_s24, %s631_s30  ;;  %s722_s15 = smov [#allocation9]  }
  0x7b   : > { %v292_v5 = vmax.f32 %v291_v4, 0.0  ;;  %s635_s1 = sshll.u32 %s722_s15, 4  ;;  %s636_s1 = int_to_ptr.vmem [resolvable:$false] %s635_s1 }
  0x7c   : > { %p633_p12 = pnand %p632_p4, %p1033_p10  ;;  %s637_s29 = scalar_lea.vmem %s636_s1, 256 }
  0x7d   : > { %299 = vadd.xlane.f32.xlu0 %v292_v5  ;;  %p638_p8 = scmp.lt.s32.totalorder %s955_s24, %s636_s1  ;;  %p639_p9 = scmp.lt.s32.totalorder %s637_s29, %s631_s30 }
  0x7e   : > { %p634_p1 = pneg %p633_p12 }
  0x7f   : > { %p640_p6 = por %p639_p9, %p638_p8 }
  0x81   : > { %p641_p13 = pnand %p640_p6, %p634_p1 }
 0x10a   : > { %v300_v6 = vpop.xlane.xlu0 %299 }
 0x10b   : > { %v301_v7 = vrot.slane %v300_v6, 4 }
 0x10d   : > { %v302_v8 = vadd.f32 %v301_v7, %v300_v6 }
 0x10f   : > { %v303_v9 = vrot.slane %v302_v8, 2 }
 0x111   : > { %v304_v10 = vadd.f32 %v303_v9, %v302_v8 }
 0x113   : > { %v305_v11 = vrot.slane %v304_v10, 1 }
 0x115   : > { %v306_v12 = vadd.f32 %v305_v11, %v304_v10 }
 0x117   : > { %467 = vpush %v306_v12 }
 0x148   : > { %s468_s10 = spop %467 }
 0x149   : > { %v308_v13 = vstv %s468_s10 }
 0x14a   : > { %309 = vst [vmem:[%s277_s18] sm:$0xff] %v308_v13 }
 0x14b   : > { %644 = shalt.err (!%p641_p13)
}
 0x14c   : > { %s645_s5 = scalar_lea.hbm %s960_s22, 128  ;;  %s649_s8 = scalar_lea.hbm %s1010_s3, 256 }
 0x14d   : > { %p646_p11 = scmp.ne.s32.totalorder %s960_s22, %s645_s5  ;;  %p650_p7 = scmp.lt.u32.totalorder %s960_s22, %s1010_s3 }
 0x14e   : > { %p651_p3 = scmp.lt.u32.totalorder %s649_s8, %s645_s5  ;;  %p653_p4 = scmp.lt.u32.totalorder %s645_s5, %s960_s22 }
 0x14f   : > { %p647_p2 = pnand %p646_p11, %p1033_p10 }
 0x150   : > { %p652_p0 = por %p651_p3, %p650_p7 }
 0x151   : > { %p648_p5 = pneg %p647_p2 }
 0x152   : > { %p654_p12 = por %p653_p4, %p652_p0 }
 0x154   : > { %p655_p1 = pnand %p654_p12, %p648_p5 }
 0x156   : > { %658 = shalt.err (!%p655_p1)
}
 0x157   : > { %475 = dma.vmem_to_hbm [thread:$0]  (%p1033_p10), %s955_s24, 128, %s960_s22, %s311_s28  }
 0x158 PF: > { %s336_s4 = sand.u32 1, %s697_s12   ;;  %p1034_p8 = scmp.ne.s32.totalorder %s1023_s27, 0 }
 0x159   : > { %p1035_p9 = scmp.ge.s32.totalorder %s717_s17, 2  ;;  %s337_s11 = scalar_lea.sflag [#allocation5], %s336_s4 }
 0x15b   : > { %p488_p6 = pnand %p1035_p9, %p1034_p8 }
 0x15d   : > { %692 = dma.done.wait (!%p488_p6), %s337_s11, 128  }
 0x15e   : > { %694 = vsyncadd (!%p488_p6), %s337_s11, 4294967168  ;;  %s22_s17 = sadd.s32 1, %s717_s17   ;;  %s1036_s25 = sld [smem:[#allocation15_spill]] }
 0x15f   : > { %p19_p13 = scmp.ge.s32.totalorder %s22_s17, 4   ;;  %s1037_s15 = sld [smem:[#allocation13_spill]] }
 0x160   : > { %s1038_s16 = sld [smem:[#allocation14_spill]]  ;;  %s1039_s12 = smov %s701_s13 }
 0x161   : > { %s1040_s13 = smov %s705_s14  ;;  %21 = sbr.rel (!%p19_p13) target bundleno = 10 (0xa), region = 109 }
 0x164   : > { %s1041_s14 = smov %s1036_s25 }
 0x168   :  { %342 = vsyncpa [#allocation4], 1 }
 0x169   :  { %344 = vsyncpa [#allocation4 + $0x1], 1 }
 0x16a   :  { %345 = vsyncpa [#allocation7], 1 }
 0x16b   :  { %347 = vsyncpa [#allocation7 + $0x1], 1 }
 0x16c   :  { %348 = vsyncpa [#allocation5], 1 }
 0x16d   :  { %350 = vsyncpa [#allocation5 + $0x1], 1 }

</bundles_post_ra>
